<compile_context>
chip_gen: v5e
topology: v5e:2x2
jax: 0.10.0
libtpu: 0.0.40
codegen_flags: <defaults>
</compile_context>

<pallas_src>
import functools

import jax
import jax.numpy as jnp
from jax.experimental import pallas as pl
from jax.experimental.pallas import tpu as pltpu


def _round_up(n, m):
    return ((n + m - 1) // m) * m


def _cdiv(a, b):
    return (a + b - 1) // b


def _next_pow2(n):
    p = 1
    while p < n:
        p *= 2
    return p


def _pick_block_b(batch):
    """Batch-tile size: multiple of 8, <=128, prefer an exact divisor of B (no batch
    padding pass over x) and >=2 blocks (keeps both v7x TensorCores busy)."""
    if batch <= 8:
        return 8
    cap = min(128, batch)
    for tb in range(cap - cap % 8, 7, -8):
        if batch % tb == 0 and batch // tb >= 2:
            return tb
    tb = min(128, _round_up(batch, 8))
    if _round_up(batch, tb) // tb < 2 and tb > 8:
        tb = max(8, _round_up(tb // 2, 8))
    return tb


def _dsdnet_kernel(x_ref, e_ref, wt_ref, we_ref, b_ref, o_ref, acc_ref, *, inv_l_out):
    """Grid = (batch blocks [parallel], seq chunks [arbitrary]).

    x_ref : (TB, G, 8, 128)  lane-dense chunk of the flattened (seq*chan) axis
    e_ref : (TB, E)          first/last (w-1) rows of x, flattened + zero padded
    wt_ref: (128, outP)      Wsum tiled across lanes (lane q -> channel q % c_pad)
    we_ref: (E, outP)        edge-correction weights (partial tap sums)
    b_ref : (1, outP)        conv bias
    o_ref : (TB, outP)       mean-pooled conv features (resident across seq chunks)
    acc_ref:(TB, 8, 128) f32 per-lane running sums
    """
    j = pl.program_id(1)

    @pl.when(j == 0)
    def _init():
        acc_ref[...] = jnp.zeros_like(acc_ref)

    # Streaming per-lane partial sums of this chunk: pure VPU vreg adds, f32 accum.
    acc_ref[...] += jnp.sum(x_ref[...], axis=1, dtype=jnp.float32)

    @pl.when(j == pl.num_programs(1) - 1)
    def _finalize():
        slab = jnp.sum(acc_ref[...], axis=1)                    # (TB, 128) f32
        tot = jnp.dot(slab, wt_ref[...],
                      preferred_element_type=jnp.float32)        # (TB, outP)
        edge = jnp.dot(e_ref[...].astype(jnp.float32), we_ref[...],
                       preferred_element_type=jnp.float32)       # (TB, outP)
        o_ref[...] = ((tot - edge) * inv_l_out + b_ref[...]).astype(o_ref.dtype)


def dsdnet_forward(x, weight, bias, w_taps, *, block_b=None, x_buffer_bytes=2 << 20):
    """x: (B, seqL, inDims) pre-permute (PyTorch layout), or 2-D (B, N) which — as in
    the PyTorch module — becomes (B, 1, N) before the permute.
    weight: (outDims, inDims, w) [PyTorch Conv1d layout]; bias: (outDims,).
    Returns (B, outDims)."""
    if x.ndim < 3:
        x = x[:, None, :]            # torch: unsqueeze(1), then permute inside the conv path
    B, seq_len, in_dims = x.shape
    out_dims = weight.shape[0]
    assert seq_len >= w_taps, "seqL must be >= conv kernel width"
    assert weight.shape == (out_dims, in_dims, w_taps)
    assert in_dims <= 128, "TODO(synk): tile the channel axis for inDims > 128"

    l_out = seq_len - w_taps + 1
    out_p = _round_up(out_dims, 128)
    itemsize = jnp.dtype(x.dtype).itemsize

    # ---- weights (tiny, f32) --------------------------------------------------
    w_kco = jnp.transpose(weight, (2, 1, 0)).astype(jnp.float32)       # (w, C, out)
    if out_p != out_dims:
        w_kco = jnp.pad(w_kco, ((0, 0), (0, 0), (0, out_p - out_dims)))
    b_k = jnp.pad(bias.astype(jnp.float32), (0, out_p - out_dims)).reshape(1, out_p)

    c_pad = _next_pow2(max(in_dims, 1))           # channel stride that divides 128
    w_sum = jnp.sum(w_kco, axis=0)                                      # (C, outP)
    if c_pad != in_dims:
        w_sum = jnp.pad(w_sum, ((0, c_pad - in_dims), (0, 0)))
    # lane q of the accumulated slab holds channel (q % c_pad) partial sums, so a
    # lane-tiled Wsum turns the per-channel contraction into one K=128 matmul.
    w_tiled = jnp.tile(w_sum, (128 // c_pad, 1))                        # (128, outP)

    # ---- edge correction (first / last w-1 rows) ------------------------------
    e_len = 2 * (w_taps - 1) * in_dims
    e_dim = _round_up(max(e_len, 1), 128)
    if e_len > 0:
        d_head = jnp.stack([jnp.sum(w_kco[p + 1:], axis=0) for p in range(w_taps - 1)])
        d_tail = jnp.stack([jnp.sum(w_kco[:p + 1], axis=0) for p in range(w_taps - 1)])
        w_edge = jnp.concatenate([d_head, d_tail], axis=0).reshape(e_len, out_p)
        w_edge = jnp.pad(w_edge, ((0, e_dim - e_len), (0, 0)))
        e_rows = jnp.concatenate(
            [x[:, : w_taps - 1, :], x[:, seq_len - w_taps + 1:, :]], axis=1
        ).reshape(B, e_len)
        e_flat = jnp.pad(e_rows, ((0, 0), (0, e_dim - e_len)))
    else:  # w == 1: no edges
        w_edge = jnp.zeros((e_dim, out_p), jnp.float32)
        e_flat = jnp.zeros((B, e_dim), x.dtype)

    # ---- x: lane-dense flat layout (B, groups, 8, 128) ------------------------
    if c_pad != in_dims:
        # TODO(synk): this channel pad is an extra HBM pass; only hit for non-pow2 inDims.
        x = jnp.pad(x, ((0, 0), (0, 0), (0, c_pad - in_dims)))
    flat_len = seq_len * c_pad
    x_flat = x.reshape(B, flat_len)

    n_groups = _cdiv(_cdiv(flat_len, 128), 8)     # (8,128) vreg groups per batch row

    if block_b is None:
        block_b = _pick_block_b(B)
    block_b = max(8, _round_up(block_b, 8))
    b_pad = _round_up(B, block_b)

    # Seq-chunk size from a per-buffer VMEM budget (2 MiB default: double-buffered x
    # plus scratch stays well under the 16/32 MiB scoped defaults on v5e/v6e/v7x).
    # On v7x one may raise the budget and/or use pipeline_mode=pl.Buffered(3).
    groups_per_chunk = max(1, int(x_buffer_bytes) // (block_b * 8 * 128 * itemsize))
    groups_per_chunk = min(groups_per_chunk, n_groups)
    n_chunks = _cdiv(n_groups, groups_per_chunk)
    groups_total = n_chunks * groups_per_chunk

    pad_rows = b_pad - B
    pad_flat = groups_total * 8 * 128 - flat_len
    if pad_rows or pad_flat:
        x_flat = jnp.pad(x_flat, ((0, pad_rows), (0, pad_flat)))
    x_r = x_flat.reshape(b_pad, groups_total, 8, 128)
    if pad_rows:
        e_flat = jnp.pad(e_flat, ((0, pad_rows), (0, 0)))

    grid = (b_pad // block_b, n_chunks)
    out = pl.pallas_call(
        functools.partial(_dsdnet_kernel, inv_l_out=1.0 / l_out),
        out_shape=jax.ShapeDtypeStruct((b_pad, out_p), x.dtype),
        grid_spec=pltpu.PrefetchScalarGridSpec(
            num_scalar_prefetch=0,
            grid=grid,
            in_specs=[
                pl.BlockSpec((block_b, groups_per_chunk, 8, 128),
                             lambda i, j: (i, j, 0, 0)),
                pl.BlockSpec((block_b, e_dim), lambda i, j: (i, 0)),
                pl.BlockSpec((128, out_p), lambda i, j: (0, 0)),
                pl.BlockSpec((e_dim, out_p), lambda i, j: (0, 0)),
                pl.BlockSpec((1, out_p), lambda i, j: (0, 0)),
            ],
            out_specs=pl.BlockSpec((block_b, out_p), lambda i, j: (i, 0)),
            scratch_shapes=[pltpu.VMEM((block_b, 8, 128), jnp.float32)],
        ),
        compiler_params=pltpu.CompilerParams(
            dimension_semantics=("parallel", "arbitrary"),
        ),
    )(x_r, e_flat, w_tiled, w_edge, b_k)
    return out[:B, :out_dims]


def dsdnet_reference(x, weight, bias, w_taps):
    """Pure-JAX transcription of the PyTorch forward (independent check, f32)."""
    if x.ndim < 3:
        x = x[:, None, :]
    l_out = x.shape[1] - w_taps + 1
    w_kco = jnp.transpose(weight, (2, 1, 0)).astype(jnp.float32)   # (w, C, out)
    conv = sum(
        jnp.einsum("blc,co->blo", x[:, k:k + l_out, :].astype(jnp.float32), w_kco[k])
        for k in range(w_taps)
    )
    return jnp.mean(conv, axis=1) + bias[None, :].astype(jnp.float32)


if __name__ == "__main__":
    def run_case(B, seqL, inDims, outDims, w, dtype, key, **kw):
        kx, kw_, kb = jax.random.split(key, 3)
        x = jax.random.normal(kx, (B, seqL, inDims), dtype=jnp.float32).astype(dtype)
        weight = jax.random.normal(kw_, (outDims, inDims, w), dtype=jnp.float32) * 0.1
        bias = jax.random.normal(kb, (outDims,), dtype=jnp.float32) * 0.1
        out = jax.block_until_ready(dsdnet_forward(x, weight, bias, w, **kw))
        ref = dsdnet_reference(x, weight, bias, w)
        assert out.shape == (B, outDims), out.shape
        return out, ref

    key = jax.random.PRNGKey(0)

    # 1) small deterministic config matching the module defaults
    out, ref = run_case(2, 16, 4, 8, 5, jnp.float32, key)
    assert jnp.allclose(out, ref, atol=1e-4, rtol=1e-4), float(jnp.max(jnp.abs(out - ref)))

    # 2) padding + multi-chunk path: non-pow2 inDims, odd batch/seq, several seq chunks
    out, ref = run_case(10, 600, 3, 10, 5, jnp.float32, jax.random.PRNGKey(1),
                        x_buffer_bytes=32 * 1024)
    assert jnp.allclose(out, ref, atol=1e-3, rtol=1e-3), float(jnp.max(jnp.abs(out - ref)))

    # 3) bf16 input (f32 accumulation inside the kernel; loose tolerance for bf16 output)
    out, ref = run_case(4, 128, 1, 16, 5, jnp.bfloat16, jax.random.PRNGKey(2))
    assert jnp.allclose(out.astype(jnp.float32), ref, atol=2e-2, rtol=2e-2)

    print("KERNEL_OK")
</pallas_src>

<mosaic_0001>
module attributes {stable_mosaic.version = 11 : i64} {
  func.func @_dsdnet_kernel(%arg0: i32, %arg1: i32, %arg2: memref<8x1x8x128xf32, #tpu.memory_space<vmem>>, %arg3: memref<8x128xf32, #tpu.memory_space<vmem>>, %arg4: memref<128x128xf32, #tpu.memory_space<vmem>>, %arg5: memref<128x128xf32, #tpu.memory_space<vmem>>, %arg6: memref<1x128xf32, #tpu.memory_space<vmem>>, %arg7: memref<8x128xf32, #tpu.memory_space<vmem>>, %arg8: memref<8x8x128xf32, #tpu.memory_space<vmem>>) attributes {dimension_semantics = [#tpu.dimension_semantics<parallel>, #tpu.dimension_semantics<arbitrary>], iteration_bounds = array<i64: 1, 1>, scalar_prefetch = 0 : i64, scratch_operands = 1 : i64, tpu.core_type = #tpu.core_type<tc>, window_params = [{transform_indices = @transform_0, window_bounds = array<i64: 8, 1, 8, 128>}, {transform_indices = @transform_1, window_bounds = array<i64: 8, 128>}, {pipeline_mode = #tpu.pipeline_mode<synchronous>, transform_indices = @transform_2, window_bounds = array<i64: 128, 128>}, {pipeline_mode = #tpu.pipeline_mode<synchronous>, transform_indices = @transform_3, window_bounds = array<i64: 128, 128>}, {pipeline_mode = #tpu.pipeline_mode<synchronous>, transform_indices = @transform_4, window_bounds = array<i64: 1, 128>}, {transform_indices = @transform_5, window_bounds = array<i64: 8, 128>}]} {
    %c0_i32 = arith.constant 0 : i32
    %0 = arith.cmpi eq, %arg1, %c0_i32 : i32
    %1 = arith.extui %0 : i1 to i32
    %c0_i32_0 = arith.constant 0 : i32
    %2 = arith.cmpi ne, %1, %c0_i32_0 : i32
    scf.if %2 {
      %cst_12 = arith.constant 0.000000e+00 : f32
      %11 = vector.broadcast %cst_12 : f32 to vector<8x8x128xf32>
      %c0_13 = arith.constant 0 : index
      %c0_14 = arith.constant 0 : index
      %c0_15 = arith.constant 0 : index
      %12 = vector.load %arg8[%c0_13, %c0_14, %c0_15] : memref<8x8x128xf32, #tpu.memory_space<vmem>>, vector<8x8x128xf32>
      tpu.vector_store %arg8[%c0_13, %c0_14, %c0_15], %11 {strides = array<i32>} : memref<8x8x128xf32, #tpu.memory_space<vmem>>, vector<8x8x128xf32>,
    } else {
    }
    %c0 = arith.constant 0 : index
    %c0_1 = arith.constant 0 : index
    %c0_2 = arith.constant 0 : index
    %3 = vector.load %arg8[%c0, %c0_1, %c0_2] : memref<8x8x128xf32, #tpu.memory_space<vmem>>, vector<8x8x128xf32>
    %c0_3 = arith.constant 0 : index
    %c0_4 = arith.constant 0 : index
    %c0_5 = arith.constant 0 : index
    %c0_6 = arith.constant 0 : index
    %4 = vector.load %arg2[%c0_3, %c0_4, %c0_5, %c0_6] : memref<8x1x8x128xf32, #tpu.memory_space<vmem>>, vector<8x1x8x128xf32>
    %cst = arith.constant dense<0.000000e+00> : vector<8x8x128xf32>
    %5 = vector.multi_reduction <add>, %4, %cst [1] : vector<8x1x8x128xf32> to vector<8x8x128xf32>
    %6 = arith.addf %3, %5 : vector<8x8x128xf32>
    %c0_7 = arith.constant 0 : index
    %c0_8 = arith.constant 0 : index
    %c0_9 = arith.constant 0 : index
    %7 = vector.load %arg8[%c0_7, %c0_8, %c0_9] : memref<8x8x128xf32, #tpu.memory_space<vmem>>, vector<8x8x128xf32>
    tpu.vector_store %arg8[%c0_7, %c0_8, %c0_9], %6 {strides = array<i32>} : memref<8x8x128xf32, #tpu.memory_space<vmem>>, vector<8x8x128xf32>,
    %c0_i32_10 = arith.constant 0 : i32
    %8 = arith.cmpi eq, %arg1, %c0_i32_10 : i32
    %9 = arith.extui %8 : i1 to i32
    %c0_i32_11 = arith.constant 0 : i32
    %10 = arith.cmpi ne, %9, %c0_i32_11 : i32
    scf.if %10 {
      %c0_12 = arith.constant 0 : index
      %c0_13 = arith.constant 0 : index
      %c0_14 = arith.constant 0 : index
      %11 = vector.load %arg8[%c0_12, %c0_13, %c0_14] : memref<8x8x128xf32, #tpu.memory_space<vmem>>, vector<8x8x128xf32>
      %cst_15 = arith.constant dense<0.000000e+00> : vector<8x128xf32>
      %12 = vector.multi_reduction <add>, %11, %cst_15 [1] : vector<8x8x128xf32> to vector<8x128xf32>
      %c0_16 = arith.constant 0 : index
      %c0_17 = arith.constant 0 : index
      %13 = vector.load %arg4[%c0_16, %c0_17] : memref<128x128xf32, #tpu.memory_space<vmem>>, vector<128x128xf32>
      %cst_18 = arith.constant dense<0.000000e+00> : vector<8x128xf32>
      %14 = tpu.matmul %12, %13, %cst_18 {dimension_numbers = #tpu.dot_dimension_numbers<[1], [0], [0], [1], [0, 0, 1, 1], [], []>} : vector<8x128xf32>, vector<128x128xf32>, vector<8x128xf32> -> vector<8x128xf32>
      %c0_19 = arith.constant 0 : index
      %c0_20 = arith.constant 0 : index
      %15 = vector.load %arg3[%c0_19, %c0_20] : memref<8x128xf32, #tpu.memory_space<vmem>>, vector<8x128xf32>
      %c0_21 = arith.constant 0 : index
      %c0_22 = arith.constant 0 : index
      %16 = vector.load %arg5[%c0_21, %c0_22] : memref<128x128xf32, #tpu.memory_space<vmem>>, vector<128x128xf32>
      %cst_23 = arith.constant dense<0.000000e+00> : vector<8x128xf32>
      %17 = tpu.matmul %15, %16, %cst_23 {dimension_numbers = #tpu.dot_dimension_numbers<[1], [0], [0], [1], [0, 0, 1, 1], [], []>} : vector<8x128xf32>, vector<128x128xf32>, vector<8x128xf32> -> vector<8x128xf32>
      %18 = arith.subf %14, %17 : vector<8x128xf32>
      %cst_24 = arith.constant 0.0833333358 : f32
      %19 = vector.broadcast %cst_24 : f32 to vector<8x128xf32>
      %20 = arith.mulf %18, %19 : vector<8x128xf32>
      %c0_25 = arith.constant 0 : index
      %c0_26 = arith.constant 0 : index
      %21 = vector.load %arg6[%c0_25, %c0_26] : memref<1x128xf32, #tpu.memory_space<vmem>>, vector<1x128xf32>
      %22 = vector.broadcast %21 : vector<1x128xf32> to vector<8x128xf32>
      %23 = arith.addf %20, %22 : vector<8x128xf32>
      %c0_27 = arith.constant 0 : index
      %c0_28 = arith.constant 0 : index
      %24 = vector.load %arg7[%c0_27, %c0_28] : memref<8x128xf32, #tpu.memory_space<vmem>>, vector<8x128xf32>
      tpu.vector_store %arg7[%c0_27, %c0_28], %23 {strides = array<i32>} : memref<8x128xf32, #tpu.memory_space<vmem>>, vector<8x128xf32>,
    } else {
    }
    return
  }
  func.func @transform_0(%arg0: i32, %arg1: i32) -> (i32, i32, i32, i32) {
    %c0_i32 = arith.constant 0 : i32
    %c0_i32_0 = arith.constant 0 : i32
    %c0_i32_1 = arith.constant 0 : i32
    return %arg0, %arg1, %c0_i32, %c0_i32_0 : i32, i32, i32, i32
  }
  func.func @transform_1(%arg0: i32, %arg1: i32) -> (i32, i32) {
    %c0_i32 = arith.constant 0 : i32
    %c0_i32_0 = arith.constant 0 : i32
    return %arg0, %c0_i32 : i32, i32
  }
  func.func @transform_2(%arg0: i32, %arg1: i32) -> (i32, i32) {
    %c0_i32 = arith.constant 0 : i32
    %c0_i32_0 = arith.constant 0 : i32
    %c0_i32_1 = arith.constant 0 : i32
    return %c0_i32, %c0_i32_0 : i32, i32
  }
  func.func @transform_3(%arg0: i32, %arg1: i32) -> (i32, i32) {
    %c0_i32 = arith.constant 0 : i32
    %c0_i32_0 = arith.constant 0 : i32
    %c0_i32_1 = arith.constant 0 : i32
    return %c0_i32, %c0_i32_0 : i32, i32
  }
  func.func @transform_4(%arg0: i32, %arg1: i32) -> (i32, i32) {
    %c0_i32 = arith.constant 0 : i32
    %c0_i32_0 = arith.constant 0 : i32
    %c0_i32_1 = arith.constant 0 : i32
    return %c0_i32, %c0_i32_0 : i32, i32
  }
  func.func @transform_5(%arg0: i32, %arg1: i32) -> (i32, i32) {
    %c0_i32 = arith.constant 0 : i32
    %c0_i32_0 = arith.constant 0 : i32
    return %arg0, %c0_i32 : i32, i32
  }
}

</mosaic_0001>

<bundles_post_ra>
// kernel: tpu_custom_call.1
= control target key start
LH: loop header
LB: loop body
LE: loop exit
PB: predicated region body
PF: predicated region fallthrough
CT: control target
= control target key end

     0   :  { %10 = vsyncpa [#allocation4], 0  ;;  %s509_s0 = inlined_call_operand.hbm [shape: f32[8,1,8,128], index: 0, kind: input, shape index: {}]   ;;  %s510_s1 = inlined_call_operand.hbm [shape: f32[8,128], index: 1, kind: input, shape index: {}]   ;;  %s511_s2 = inlined_call_operand.hbm [shape: f32[128,128], index: 2, kind: input, shape index: {}]   ;;  %s512_s3 = inlined_call_operand.hbm [shape: f32[128,128], index: 3, kind: input, shape index: {}]   ;;  %s513_s4 = inlined_call_operand.vmem [shape: f32[1,128], index: 4, kind: input, shape index: {}]   ;;  %s514_s5 = inlined_call_operand.hbm [shape: f32[8,128], index: 5, kind: output, shape index: {}]  }
   0x1   :  { %11 = vsyncpa [#allocation7], 0 }
   0x2   :  { %12 = vsyncpa [#allocation10], 0  ;;  %s32_s20 = sshll.u32 %s510_s1, 4  ;;  %s33_s20 = int_to_ptr.hbm [resolvable:$true] %s32_s20 }
   0x3   :  { %13 = vsyncpa [#allocation5], 0  ;;  %s452_s21 = smov [#allocation6]   ;;  %s18_s25 = sshll.u32 %s509_s0, 4  ;;  %s19_s25 = int_to_ptr.hbm [resolvable:$true] %s18_s25 }
   0x4   :  { %s34_s22 = sshll.u32 %s452_s21, 4  ;;  %s453_s26 = smov [#allocation3]   ;;  %s35_s22 = int_to_ptr.vmem [resolvable:$true] %s34_s22 }
   0x5   :  { %37 = dma.hbm_to_vmem [thread:$0]  %s33_s20, 128, %s35_s22, [#allocation7]  }
   0x6   :  { %s20_s27 = sshll.u32 %s453_s26, 4  ;;  %s454_s28 = smov 128   ;;  %s21_s27 = int_to_ptr.vmem [resolvable:$true] %s20_s27 }
   0x7   :  { %s455_s29 = smov 8   ;;  %s42_s1 = sshll.u32 %s511_s2, 4  ;;  %s43_s1 = int_to_ptr.hbm [resolvable:$true] %s42_s1 }
   0x8   :  { %26 = dma.hbm_to_vmem [thread:$0]  %s19_s25, 1024, %s21_s27, [#allocation4], %s454_s28, %s454_s28, %s455_s29  }
   0x9   :  { %s456_s7 = smov [#allocation8]   ;;  %s55_s0 = sshll.u32 %s512_s3, 4  ;;  %s56_s0 = int_to_ptr.hbm [resolvable:$true] %s55_s0 }
   0xa   :  { %s44_s8 = sshll.u32 %s456_s7, 4  ;;  %s457_s11 = smov [#allocation9]   ;;  %s45_s8 = int_to_ptr.vmem [resolvable:$true] %s44_s8 }
   0xb   :  { %50 = dma.hbm_to_vmem [thread:$0]  %s43_s1, 2048, %s45_s8, [#allocation7], %s454_s28, %s454_s28, %s455_s29  }
   0xc   :  { %s57_s12 = sshll.u32 %s457_s11, 4  ;;  %s58_s12 = int_to_ptr.vmem [resolvable:$true] %s57_s12 }
   0xd   :  { %63 = dma.hbm_to_vmem [thread:$0]  %s56_s0, 2048, %s58_s12, [#allocation10], %s454_s28, %s454_s28, %s455_s29  }
   0xe   :  { %444 = dma.done.wait [#allocation4], 1024  }
   0xf   :  { %445 = vsyncadd [#allocation4], 4294966272 }
  0x10   :  { %446 = dma.done.wait [#allocation7], 2176  }
  0x11   :  { %447 = vsyncadd [#allocation7], 4294965120 }
  0x12   :  { %448 = dma.done.wait [#allocation10], 2048  }
  0x13   :  { %449 = vsyncadd [#allocation10], 4294965248  ;;  %v208_v0 = vld [vmem:[#allocation8 + $0x78] sm:$0xff]  ;;  %v207_v2 = vld [vmem:[#allocation8 + $0x70] sm:$0xff]  ;;  %vm217_vm0 = vcmask 1041409   ;;  %vm219_vm1 = vcmask 1042434  }
  0x14   :  { %v268_v1 = vld [vmem:[#allocation9 + $0x78] sm:$0xff]  ;;  %232 = vmatpush.msra.mxu0 %v208_v0  ;;  %v267_v3 = vld [vmem:[#allocation9 + $0x70] sm:$0xff]  ;;  %v206_v4 = vld [vmem:[#allocation8 + $0x68] sm:$0xff]  ;;  %vm221_vm2 = vcmask 1043459   ;;  %vm223_vm3 = vcmask 1044484   ;;  %vm225_vm4 = vcmask 1045509  }
  0x15   :  { %269 = vmatpush.msra.mxu1 %v268_v1  ;;  %v266_v5 = vld [vmem:[#allocation9 + $0x68] sm:$0xff]  ;;  %v205_v6 = vld [vmem:[#allocation8 + $0x60] sm:$0xff]  ;;  %v204_v8 = vld [vmem:[#allocation8 + $0x58] sm:$0xff]  ;;  %vm227_vm5 = vcmask 1046534   ;;  %vm229_vm6 = vcmask 1047559   ;;  %s458_s13 = smov [#allocation11]  }
  0x16   :  { %233 = vmatpush.msra.mxu0 %v207_v2  ;;  %v265_v7 = vld [vmem:[#allocation9 + $0x60] sm:$0xff]  ;;  %v264_v9 = vld [vmem:[#allocation9 + $0x58] sm:$0xff]  ;;  %v203_v10 = vld [vmem:[#allocation8 + $0x50] sm:$0xff]  ;;  %s302_s14 = sshll.u32 %s458_s13, 4  ;;  %s304_s17 = sshll.u32 %s514_s5, 4  ;;  %s303_s14 = int_to_ptr.vmem [resolvable:$true] %s302_s14  ;;  %s305_s17 = int_to_ptr.hbm [resolvable:$true] %s304_s17 }
  0x17   :  { %270 = vmatpush.msra.mxu1 %v267_v3  ;;  %v263_v11 = vld [vmem:[#allocation9 + $0x50] sm:$0xff]  ;;  %v202_v12 = vld [vmem:[#allocation8 + $0x48] sm:$0xff]  ;;  %v201_v14 = vld [vmem:[#allocation8 + $0x40] sm:$0xff] }
  0x18   :  { %234 = vmatpush.msra.mxu0 %v206_v4  ;;  %v262_v13 = vld [vmem:[#allocation9 + $0x48] sm:$0xff]  ;;  %v261_v15 = vld [vmem:[#allocation9 + $0x40] sm:$0xff]  ;;  %v102_v16 = vld [vmem:[#allocation3] sm:$0xff] }
  0x19   :  { %271 = vmatpush.msra.mxu1 %v266_v5  ;;  %v103_v17 = vld [vmem:[#allocation3 + $0x8] sm:$0xff]  ;;  %v104_v18 = vld [vmem:[#allocation3 + $0x10] sm:$0xff]  ;;  %v105_v19 = vld [vmem:[#allocation3 + $0x18] sm:$0xff]  ;;  %v145_v20 = vrot.slane %v102_v16, 4 }
  0x1a   :  { %235 = vmatpush.msra.mxu0 %v205_v6  ;;  %v106_v21 = vld [vmem:[#allocation3 + $0x20] sm:$0xff]  ;;  %v107_v22 = vld [vmem:[#allocation3 + $0x28] sm:$0xff]  ;;  %v108_v23 = vld [vmem:[#allocation3 + $0x30] sm:$0xff]  ;;  %v151_v24 = vrot.slane %v103_v17, 4  ;;  %v157_v25 = vrot.slane %v104_v18, 4  ;;  %v163_v26 = vrot.slane %v105_v19, 4 }
  0x1b   :  { %272 = vmatpush.msra.mxu1 %v265_v7  ;;  %v109_v27 = vld [vmem:[#allocation3 + $0x38] sm:$0xff]  ;;  %v146_v28 = vadd.f32 %v145_v20, %v102_v16  ;;  %v169_v29 = vrot.slane %v106_v21, 4  ;;  %v175_v30 = vrot.slane %v107_v22, 4  ;;  %v181_v31 = vrot.slane %v108_v23, 4  ;;  %v200_v32 = vld [vmem:[#allocation8 + $0x38] sm:$0xff]  ;;  %v198_v52 = vld [vmem:[#allocation8 + $0x28] sm:$0xff] }
  0x1c   :  { %236 = vmatpush.msra.mxu0 %v204_v8  ;;  %v260_v33 = vld [vmem:[#allocation9 + $0x38] sm:$0xff]  ;;  %v152_v34 = vadd.f32 %v151_v24, %v103_v17  ;;  %v158_v35 = vadd.f32 %v157_v25, %v104_v18  ;;  %v164_v36 = vadd.f32 %v163_v26, %v105_v19  ;;  %v187_v37 = vrot.slane %v109_v27, 4  ;;  %v199_v42 = vld [vmem:[#allocation8 + $0x30] sm:$0xff]  ;;  %v258_v53 = vld [vmem:[#allocation9 + $0x28] sm:$0xff] }
  0x1d   :  { %273 = vmatpush.msra.mxu1 %v264_v9  ;;  %v147_v38 = vrot.slane %v146_v28, 2  ;;  %v170_v39 = vadd.f32 %v169_v29, %v106_v21  ;;  %v176_v40 = vadd.f32 %v175_v30, %v107_v22  ;;  %v182_v41 = vadd.f32 %v181_v31, %v108_v23  ;;  %v259_v43 = vld [vmem:[#allocation9 + $0x30] sm:$0xff]  ;;  %v197_v62 = vld [vmem:[#allocation8 + $0x20] sm:$0xff]  ;;  %v196_v8 = vld [vmem:[#allocation8 + $0x18] sm:$0xff] }
  0x1e   :  { %237 = vmatpush.msra.mxu0 %v203_v10  ;;  %v153_v44 = vrot.slane %v152_v34, 2  ;;  %v159_v45 = vrot.slane %v158_v35, 2  ;;  %v165_v46 = vrot.slane %v164_v36, 2  ;;  %v188_v47 = vadd.f32 %v187_v37, %v109_v27  ;;  %v257_v63 = vld [vmem:[#allocation9 + $0x20] sm:$0xff]  ;;  %v256_v9 = vld [vmem:[#allocation9 + $0x18] sm:$0xff]  ;;  %v255_v16 = vld [vmem:[#allocation9 + $0x10] sm:$0xff] }
  0x1f   :  { %274 = vmatpush.msra.mxu1 %v263_v11  ;;  %v148_v48 = vadd.f32 %v147_v38, %v146_v28  ;;  %v171_v49 = vrot.slane %v170_v39, 2  ;;  %v177_v50 = vrot.slane %v176_v40, 2  ;;  %v183_v51 = vrot.slane %v182_v41, 2  ;;  %v194_v21 = vld [vmem:[#allocation8 + $0x8] sm:$0xff]  ;;  %v193_v26 = vld [vmem:[#allocation8] sm:$0xff]  ;;  %v252_v30 = vld [vmem:[#allocation6] sm:$0xff] }
  0x20   :  { %238 = vmatpush.msra.mxu0 %v202_v12  ;;  %v154_v54 = vadd.f32 %v153_v44, %v152_v34  ;;  %v160_v55 = vadd.f32 %v159_v45, %v158_v35  ;;  %v166_v56 = vadd.f32 %v165_v46, %v164_v36  ;;  %v189_v57 = vrot.slane %v188_v47, 2  ;;  %v254_v22 = vld [vmem:[#allocation9 + $0x8] sm:$0xff]  ;;  %v253_v27 = vld [vmem:[#allocation9] sm:$0xff]  ;;  %v323_v35 = vld [vmem:[%s513_s4] ss:$0 sm:$0xff] }
  0x21   :  { %275 = vmatpush.msra.mxu1 %v262_v13  ;;  %v149_v58 = vrot.slane %v148_v48, 1  ;;  %v172_v59 = vadd.f32 %v171_v49, %v170_v39  ;;  %v178_v60 = vadd.f32 %v177_v50, %v176_v40  ;;  %v184_v61 = vadd.f32 %v183_v51, %v182_v41 }
  0x22   :  { %239 = vmatpush.msra.mxu0 %v201_v14  ;;  %v155_v0 = vrot.slane %v154_v54, 1  ;;  %v161_v1 = vrot.slane %v160_v55, 1  ;;  %v167_v2 = vrot.slane %v166_v56, 1  ;;  %v190_v3 = vadd.f32 %v189_v57, %v188_v47 }
  0x23   :  { %276 = vmatpush.msra.mxu1 %v261_v15  ;;  %v150_v4 = vadd.f32 %v149_v58, %v148_v48  ;;  %v173_v5 = vrot.slane %v172_v59, 1  ;;  %v179_v6 = vrot.slane %v178_v60, 1  ;;  %v185_v7 = vrot.slane %v184_v61, 1  ;;  %v195_v15 = vld [vmem:[#allocation8 + $0x10] sm:$0xff] }
  0x24   :  { %240 = vmatpush.msra.mxu0 %v200_v32  ;;  %v156_v10 = vadd.f32 %v155_v0, %v154_v54  ;;  %v162_v11 = vadd.f32 %v161_v1, %v160_v55  ;;  %v168_v12 = vadd.f32 %v167_v2, %v166_v56  ;;  %v191_v13 = vrot.slane %v190_v3, 1 }
  0x25   :  { %277 = vmatpush.msra.mxu1 %v260_v33  ;;  %v174_v14 = vadd.f32 %v173_v5, %v172_v59  ;;  %v180_v17 = vadd.f32 %v179_v6, %v178_v60  ;;  %v186_v19 = vadd.f32 %v185_v7, %v184_v61 }
  0x26   :  { %241 = vmatpush.msra.mxu0 %v199_v42  ;;  %v218_v18 = vsel %vm217_vm0, %v156_v10, %v150_v4  ;;  %v192_v23 = vadd.f32 %v191_v13, %v190_v3 }
  0x27   :  { %278 = vmatpush.msra.mxu1 %v259_v43  ;;  %v220_v20 = vsel %vm219_vm1, %v162_v11, %v218_v18 }
  0x28   :  { %242 = vmatpush.msra.mxu0 %v198_v52  ;;  %v222_v24 = vsel %vm221_vm2, %v168_v12, %v220_v20 }
  0x29   :  { %279 = vmatpush.msra.mxu1 %v258_v53  ;;  %v224_v25 = vsel %vm223_vm3, %v174_v14, %v222_v24 }
  0x2a   :  { %243 = vmatpush.msra.mxu0 %v197_v62  ;;  %v226_v28 = vsel %vm225_vm4, %v180_v17, %v224_v25 }
  0x2b   :  { %280 = vmatpush.msra.mxu1 %v257_v63  ;;  %v228_v29 = vsel %vm227_vm5, %v186_v19, %v226_v28 }
  0x2c   :  { %244 = vmatpush.msra.mxu0 %v196_v8  ;;  %v230_v31 = vsel %vm229_vm6, %v192_v23, %v228_v29 }
  0x2d   :  { %281 = vmatpush.msra.mxu1 %v256_v9 }
  0x2e   :  { %245 = vmatpush.msra.mxu0 %v195_v15 }
  0x2f   :  { %282 = vmatpush.msra.mxu1 %v255_v16 }
  0x30   :  { %246 = vmatpush.msra.mxu0 %v194_v21 }
  0x31   :  { %283 = vmatpush.msra.mxu1 %v254_v22 }
  0x32   :  { %247 = vmatpush.msra.mxu0 %v193_v26 }
  0x33   :  { %284 = vmatpush.msra.mxu1 %v253_v27  ;;  %248 = vmatmul.f32.vlgmr.msra.gmra.mxu0 %v230_v31 }
  0x34   :  { %285 = vmatmul.f32.vlgmr.msra.gmra.mxu1 %v252_v30 }
  0xb0   :  { %v249_v32 = vpop.f32.mrf.mxu0 }
  0xb1   :  { %v286_v33 = vpop.f32.mrf.mxu1 }
  0xb2   :  { %v289_v34 = vsub.f32 %v249_v32, %v286_v33 }
  0xb4   :  { %v290_v36 = vmul.f32 0.083333336, %v289_v34 }
  0xb6   :  { %v295_v37 = vadd.f32 %v323_v35, %v290_v36 }
  0xb8   :  { %296 = vst [vmem:[#allocation11] sm:$0xff] %v295_v37 }
  0xb9   :  { %307 = dma.vmem_to_hbm [thread:$0]  %s303_s14, 128, %s305_s17, [#allocation5]  }
  0xba   :  { %450 = dma.done.wait [#allocation5], 128  }
  0xbb   :  { %451 = vsyncadd [#allocation5], 4294967168 }
  0xbc   :  { %312 = vsyncpa [#allocation4], 1 }
  0xbd   :  { %313 = vsyncpa [#allocation7], 1 }
  0xbe   :  { %314 = vsyncpa [#allocation10], 1 }
  0xbf   :  { %315 = vsyncpa [#allocation5], 1 }

</bundles_post_ra>
